<compile_context>
chip_gen: v7x
topology: tpu7x:2x2x1
jax: 0.10.0
libtpu: 0.0.40
codegen_flags: <defaults>
</compile_context>

<pallas_src>
import functools

import jax
import jax.numpy as jnp
from jax.experimental import pallas as pl
from jax.experimental.pallas import tpu as pltpu

_LANE = 128


def _cdiv(a, b):
    return -(-a // b)


# ----------------------------------------------------------------------------
# Kernel
# ----------------------------------------------------------------------------
def _mlp_1x1_kernel(n_layers_total, compute_dtype, x_ref, *refs):
    """Fused per-pixel MLP on a (C_in, tile_s) slab (spatial on lanes).

    refs = (w_0, b_0, w_1, b_1, ..., w_{L-1}, b_{L-1}, o_ref)
    w_i: (C_out_i, C_in_i), b_i: (C_out_i, 1).
    ReLU after every layer except the last (conv2).  Matmuls run on the MXU
    in `compute_dtype` with f32 accumulation; bias add / ReLU stay f32.
    """
    o_ref = refs[-1]
    wb_refs = refs[:-1]
    h = x_ref[...]                                          # (C_in, tile_s)
    for layer in range(n_layers_total):
        w = wb_refs[2 * layer][...]                         # (C_out, C_in)
        b = wb_refs[2 * layer + 1][...]                     # (C_out, 1)
        h = jnp.dot(w.astype(compute_dtype), h.astype(compute_dtype),
                    preferred_element_type=jnp.float32)
        h = h + b.astype(jnp.float32)
        if layer != n_layers_total - 1:
            h = jnp.maximum(h, 0.0)
    o_ref[...] = h.astype(o_ref.dtype)


# ----------------------------------------------------------------------------
# Tile selection (generation-aware)
# ----------------------------------------------------------------------------
def _vmem_capacity_bytes():
    """Per-TensorCore VMEM; conservative (v7x: 64 MiB) if the query fails."""
    try:
        info = pltpu.get_tpu_info()
        for attr in ("vmem_capacity_bytes", "vmem_bytes", "vmem_size_bytes"):
            v = getattr(info, attr, None)
            if v:
                return int(v)
    except Exception:
        pass
    return 64 << 20


def _select_tile(s_total, n_batch, c_in, c_out, hidden_dims, requested):
    """Pick the spatial (lane) tile.

    Targets ~16K lanes per step (amortizes per-step pipeline overhead and
    makes each of the C_in strided input rows one long contiguous DMA),
    capped by a per-generation VMEM budget, and clamped so the total grid has
    at least ~4 steps for dual-TensorCore (v7x) sharding and DMA overlap.
    """
    if requested is not None:
        tile = min(int(requested), s_total)
        assert tile == s_total or tile % _LANE == 0, (
            "tile_s must be a multiple of 128 or cover the full H*W plane")
        return tile
    if s_total <= _LANE:
        return s_total

    # Conservative f32 bytes of VMEM per spatial lane per grid step:
    # double-buffered in/out blocks + every intermediate activation slab.
    bytes_per_lane = 4 * (2 * c_in + 2 * c_out + c_in + sum(hidden_dims) + c_out)
    vmem = _vmem_capacity_bytes()
    # Headroom for weights / semaphores / compiler scratch:
    # v7x (64 MiB/TC) -> ~21 MiB budget, v5e/v6e (128 MiB) -> 28 MiB.
    budget = min(max(vmem // 3, 8 << 20), 28 << 20)
    cap = max((budget // bytes_per_lane) // _LANE * _LANE, _LANE)

    tile = min(16 * 1024, cap)            # 8K-32K sweet spot; 16K default
    if tile >= s_total:
        tile = s_total                    # whole plane in one block
    else:
        tile = max((tile // _LANE) * _LANE, _LANE)

    # Keep >= ~4 total grid steps so both v7x TensorCores get work and the
    # pipeline has something to overlap; never shrink below 1024 lanes
    # (tiny tiles hurt the v5e single-vst store path).
    if s_total >= 4 * 1024 and n_batch * _cdiv(s_total, tile) < 4:
        per_batch = _cdiv(4, n_batch)
        shrunk = _cdiv(_cdiv(s_total, per_batch), _LANE) * _LANE
        tile = max(min(shrunk, tile), 1024)
    return tile


# ----------------------------------------------------------------------------
# Wrapper
# ----------------------------------------------------------------------------
def env_ca_forward(x_nchw, weights, biases, *, tile_s=None,
                   compute_dtype=jnp.bfloat16, out_dtype=None):
    """Forward pass of Env_CA (knockout=False path).

    x_nchw : (n, num_channels*3, H, W) float32 or bfloat16
    weights: list of (C_out_i, C_in_i) matrices (squeezed 1x1 conv kernels)
    biases : list of (C_out_i, 1) columns
    tile_s : optional spatial tile override (multiple of 128); None = auto
    compute_dtype: MXU input dtype for the dots (accumulation is always f32)
    returns: (n, model_channels, H, W) in `out_dtype` (default: x dtype)
    """
    n, c_in, hh, ww = x_nchw.shape
    s_total = hh * ww
    c_out = int(weights[-1].shape[0])
    hidden_dims = [int(w.shape[0]) for w in weights[:-1]]
    n_layers_total = len(weights)
    out_dtype = x_nchw.dtype if out_dtype is None else out_dtype

    # NCHW -> (n, C, H*W): pure reshape, no transpose / extra HBM pass.
    x_flat = x_nchw.reshape(n, c_in, s_total)

    tile = _select_tile(s_total, n, c_in, c_out, hidden_dims, tile_s)
    grid = (n, _cdiv(s_total, tile))

    # Batch dim squeezed out of the kernel view; weights/biases are whole-array
    # blocks with a constant index map (fetched once, kept resident).
    # NOTE: single-buffering the constant weight blocks (pl.Buffered(1)) would
    # shave a little per-step bookkeeping, but with the large tiles below the
    # gain is negligible, so we keep the plain (robust) specs.
    in_specs = [pl.BlockSpec((None, c_in, tile), lambda b, s: (b, 0, s))]
    for wmat, bvec in zip(weights, biases):
        in_specs.append(pl.BlockSpec(wmat.shape, lambda b, s: (0, 0)))
        in_specs.append(pl.BlockSpec(bvec.shape, lambda b, s: (0, 0)))
    out_spec = pl.BlockSpec((None, c_out, tile), lambda b, s: (b, 0, s))

    flops = 2 * n * s_total * sum(int(w.shape[0]) * int(w.shape[1])
                                  for w in weights)
    bytes_accessed = (jnp.dtype(x_nchw.dtype).itemsize * n * s_total * c_in
                      + jnp.dtype(out_dtype).itemsize * n * s_total * c_out
                      + 4 * (sum(int(w.size) for w in weights)
                             + sum(int(b.size) for b in biases)))
    cost = pl.CostEstimate(flops=flops, transcendentals=0,
                           bytes_accessed=int(bytes_accessed))

    vmem_cap = _vmem_capacity_bytes()
    vmem_limit = int(max(32 << 20, min(vmem_cap * 3 // 4, 64 << 20)))

    kernel = functools.partial(_mlp_1x1_kernel, n_layers_total, compute_dtype)

    out_flat = pl.pallas_call(
        kernel,
        out_shape=jax.ShapeDtypeStruct((n, c_out, s_total), out_dtype),
        grid_spec=pltpu.PrefetchScalarGridSpec(
            num_scalar_prefetch=0,
            grid=grid,
            in_specs=in_specs,
            out_specs=out_spec,
        ),
        compiler_params=pltpu.CompilerParams(
            dimension_semantics=("parallel", "parallel"),
            vmem_limit_bytes=vmem_limit,
        ),
        cost_estimate=cost,
    )(x_flat, *[a for pair in zip(weights, biases) for a in pair])

    # (n, C_out, H*W) -> NCHW: pure reshape, no transpose.
    return out_flat.reshape(n, c_out, hh, ww)


# ----------------------------------------------------------------------------
# Parameter construction (deterministic, mirrors Env_CA.__init__)
# ----------------------------------------------------------------------------
def make_params(key, input_dim, hidden_units, model_channels):
    """conv1/hidden: xavier_uniform weight, zero bias.  conv2: zero weight+bias.

    Weights are (C_out, C_in) matrices (squeezed PyTorch 1x1 conv kernels) and
    biases are (C_out, 1) columns, matching the kernel's W @ x + b layout.
    """
    weights, biases = [], []
    c_prev = input_dim
    for h_units in hidden_units:
        bound = (6.0 / (c_prev + h_units)) ** 0.5
        key, sub = jax.random.split(key)
        w = jax.random.uniform(sub, (h_units, c_prev), jnp.float32,
                               minval=-bound, maxval=bound)
        weights.append(w)
        biases.append(jnp.zeros((h_units, 1), jnp.float32))
        c_prev = h_units
    # conv2: zero-initialized weight and bias
    weights.append(jnp.zeros((model_channels, c_prev), jnp.float32))
    biases.append(jnp.zeros((model_channels, 1), jnp.float32))
    return weights, biases


# Pure-JAX reference for verification.  compute_dtype lets us build a
# numerically matched (bf16-input, f32-accumulate) reference for tight checks.
def env_ca_forward_ref(x_nchw, weights, biases, compute_dtype=jnp.float32):
    n, c_in, hh, ww = x_nchw.shape
    h = x_nchw.reshape(n, c_in, hh * ww).astype(jnp.float32)
    for i, (wm, bv) in enumerate(zip(weights, biases)):
        h = jnp.einsum("oc,ncs->nos",
                       wm.astype(compute_dtype), h.astype(compute_dtype),
                       preferred_element_type=jnp.float32)
        h = h + bv[None].astype(jnp.float32)
        if i != len(weights) - 1:
            h = jnp.maximum(h, 0.0)
    return h.reshape(n, -1, hh, ww)


if __name__ == "__main__":
    # Small config: model_channels=4, env_channels=0 -> num_channels=4,
    # input_dim = num_channels * 3 = 12, hidden_units=[32], n_layers=1.
    model_channels = 4
    env_channels = 0
    num_channels = model_channels + env_channels
    input_dim = num_channels * 3          # 12
    hidden_units = [32]
    batch, grid_size = 2, 16

    key = jax.random.PRNGKey(0)
    key, xk = jax.random.split(key)
    x = jax.random.normal(xk, (batch, input_dim, grid_size, grid_size),
                          jnp.float32)

    # 1) Spec-faithful init (conv2 zero-initialized like the PyTorch module):
    #    output must be exactly zero.
    weights, biases = make_params(key, input_dim, hidden_units, model_channels)
    out = jax.block_until_ready(env_ca_forward(x, weights, biases))
    assert out.shape == (batch, model_channels, grid_size, grid_size)
    assert jnp.allclose(out, jnp.zeros_like(out), atol=1e-6)

    # 2) Random non-zero weights: default bf16-MXU compute path.
    key, k1, k2, k3, k4 = jax.random.split(key, 5)
    w_rand = [0.3 * jax.random.normal(k1, (hidden_units[0], input_dim), jnp.float32),
              0.3 * jax.random.normal(k2, (model_channels, hidden_units[0]), jnp.float32)]
    b_rand = [0.1 * jax.random.normal(k3, (hidden_units[0], 1), jnp.float32),
              0.1 * jax.random.normal(k4, (model_channels, 1), jnp.float32)]
    out2 = jax.block_until_ready(env_ca_forward(x, w_rand, b_rand))
    ref2_match = env_ca_forward_ref(x, w_rand, b_rand, compute_dtype=jnp.bfloat16)
    ref2_f32 = env_ca_forward_ref(x, w_rand, b_rand)
    assert jnp.allclose(out2, ref2_match, atol=1e-3, rtol=1e-3)
    assert jnp.allclose(out2, ref2_f32, atol=5e-2, rtol=5e-2)
    # f32 compute path (tighter parity with a PyTorch f32 conv) also compiles.
    out2_f32 = jax.block_until_ready(
        env_ca_forward(x, w_rand, b_rand, compute_dtype=jnp.float32))
    assert jnp.allclose(out2_f32, ref2_f32, atol=5e-2, rtol=5e-2)

    # 3) Ragged spatial size: H*W = 400 with a forced tiny tile (test-only)
    #    exercises the cdiv grid + lane-local edge-tile handling.
    gs3 = 20
    key, xk3 = jax.random.split(key)
    x3 = jax.random.normal(xk3, (batch, input_dim, gs3, gs3), jnp.float32)
    out3 = jax.block_until_ready(env_ca_forward(x3, w_rand, b_rand, tile_s=128))
    ref3 = env_ca_forward_ref(x3, w_rand, b_rand, compute_dtype=jnp.bfloat16)
    assert out3.shape == (batch, model_channels, gs3, gs3)
    assert jnp.allclose(out3, ref3, atol=1e-3, rtol=1e-3)

    # 4) Larger plane (1, 12, 128, 128): auto tile selection exercises the
    #    >=4-grid-step clamp and multi-tile spatial pipelining.
    gs4 = 128
    key, xk4 = jax.random.split(key)
    x4 = jax.random.normal(xk4, (1, input_dim, gs4, gs4), jnp.float32)
    out4 = jax.block_until_ready(env_ca_forward(x4, w_rand, b_rand))
    ref4 = env_ca_forward_ref(x4, w_rand, b_rand, compute_dtype=jnp.bfloat16)
    assert jnp.allclose(out4, ref4, atol=1e-3, rtol=1e-3)

    # 5) Optional bf16 HBM storage (halves the HBM roofline); output follows
    #    the input dtype.
    out5 = jax.block_until_ready(env_ca_forward(x.astype(jnp.bfloat16),
                                                w_rand, b_rand))
    assert out5.dtype == jnp.bfloat16
    ref5 = env_ca_forward_ref(x.astype(jnp.bfloat16), w_rand, b_rand,
                              compute_dtype=jnp.bfloat16)
    assert jnp.allclose(out5.astype(jnp.float32), ref5, atol=1e-2, rtol=1e-2)

    # 6) Multi-hidden-layer variant (n_layers > 1 branch of the module).
    hidden2 = [32, 16]
    dims = [input_dim] + hidden2 + [model_channels]
    key, *ks = jax.random.split(key, 7)
    w_ml = [0.3 * jax.random.normal(ks[i], (dims[i + 1], dims[i]), jnp.float32)
            for i in range(len(dims) - 1)]
    b_ml = [0.1 * jax.random.normal(ks[3 + i], (dims[i + 1], 1), jnp.float32)
            for i in range(len(dims) - 1)]
    out6 = jax.block_until_ready(env_ca_forward(x, w_ml, b_ml))
    ref6 = env_ca_forward_ref(x, w_ml, b_ml, compute_dtype=jnp.bfloat16)
    assert jnp.allclose(out6, ref6, atol=1e-3, rtol=1e-3)

    print("KERNEL_OK")
</pallas_src>

<mosaic_0001>
module attributes {stable_mosaic.version = 11 : i64} {
  func.func @_mlp_1x1_kernel(%arg0: i32, %arg1: i32, %arg2: memref<1x12x256xf32, #tpu.memory_space<vmem>>, %arg3: memref<32x12xf32, #tpu.memory_space<vmem>>, %arg4: memref<32x1xf32, #tpu.memory_space<vmem>>, %arg5: memref<4x32xf32, #tpu.memory_space<vmem>>, %arg6: memref<4x1xf32, #tpu.memory_space<vmem>>, %arg7: memref<1x4x256xf32, #tpu.memory_space<vmem>>) attributes {dimension_semantics = [#tpu.dimension_semantics<parallel>, #tpu.dimension_semantics<parallel>], iteration_bounds = array<i64: 2, 1>, scalar_prefetch = 0 : i64, scratch_operands = 0 : i64, tpu.core_type = #tpu.core_type<tc>, window_params = [{transform_indices = @transform_0, window_bounds = array<i64: 1, 12, 256>}, {pipeline_mode = #tpu.pipeline_mode<synchronous>, transform_indices = @transform_1, window_bounds = array<i64: 32, 12>}, {pipeline_mode = #tpu.pipeline_mode<synchronous>, transform_indices = @transform_2, window_bounds = array<i64: 32, 1>}, {pipeline_mode = #tpu.pipeline_mode<synchronous>, transform_indices = @transform_3, window_bounds = array<i64: 4, 32>}, {pipeline_mode = #tpu.pipeline_mode<synchronous>, transform_indices = @transform_4, window_bounds = array<i64: 4, 1>}, {transform_indices = @transform_5, window_bounds = array<i64: 1, 4, 256>}]} {
    %c0 = arith.constant 0 : index
    %c0_0 = arith.constant 0 : index
    %c0_1 = arith.constant 0 : index
    %0 = vector.load %arg2[%c0, %c0_0, %c0_1] : memref<1x12x256xf32, #tpu.memory_space<vmem>>, vector<1x12x256xf32>
    %1 = vector.shape_cast %0 : vector<1x12x256xf32> to vector<12x256xf32>
    %c0_2 = arith.constant 0 : index
    %c0_3 = arith.constant 0 : index
    %2 = vector.load %arg3[%c0_2, %c0_3] : memref<32x12xf32, #tpu.memory_space<vmem>>, vector<32x12xf32>
    %c0_4 = arith.constant 0 : index
    %c0_5 = arith.constant 0 : index
    %3 = vector.load %arg4[%c0_4, %c0_5] : memref<32x1xf32, #tpu.memory_space<vmem>>, vector<32x1xf32>
    %4 = arith.truncf %2 : vector<32x12xf32> to vector<32x12xbf16>
    %5 = arith.truncf %1 : vector<12x256xf32> to vector<12x256xbf16>
    %cst = arith.constant dense<0.000000e+00> : vector<32x256xf32>
    %6 = tpu.matmul %4, %5, %cst {dimension_numbers = #tpu.dot_dimension_numbers<[1], [0], [0], [1], [0, 0, 1, 1], [], []>} : vector<32x12xbf16>, vector<12x256xbf16>, vector<32x256xf32> -> vector<32x256xf32>
    %7 = vector.broadcast %3 : vector<32x1xf32> to vector<32x256xf32>
    %8 = arith.addf %6, %7 : vector<32x256xf32>
    %cst_6 = arith.constant 0.000000e+00 : f32
    %9 = vector.broadcast %cst_6 : f32 to vector<32x256xf32>
    %10 = arith.maximumf %8, %9 : vector<32x256xf32>
    %c0_7 = arith.constant 0 : index
    %c0_8 = arith.constant 0 : index
    %11 = vector.load %arg5[%c0_7, %c0_8] : memref<4x32xf32, #tpu.memory_space<vmem>>, vector<4x32xf32>
    %c0_9 = arith.constant 0 : index
    %c0_10 = arith.constant 0 : index
    %12 = vector.load %arg6[%c0_9, %c0_10] : memref<4x1xf32, #tpu.memory_space<vmem>>, vector<4x1xf32>
    %13 = arith.truncf %11 : vector<4x32xf32> to vector<4x32xbf16>
    %14 = arith.truncf %10 : vector<32x256xf32> to vector<32x256xbf16>
    %cst_11 = arith.constant dense<0.000000e+00> : vector<4x256xf32>
    %15 = tpu.matmul %13, %14, %cst_11 {dimension_numbers = #tpu.dot_dimension_numbers<[1], [0], [0], [1], [0, 0, 1, 1], [], []>} : vector<4x32xbf16>, vector<32x256xbf16>, vector<4x256xf32> -> vector<4x256xf32>
    %16 = vector.broadcast %12 : vector<4x1xf32> to vector<4x256xf32>
    %17 = arith.addf %15, %16 : vector<4x256xf32>
    %c0_12 = arith.constant 0 : index
    %c0_13 = arith.constant 0 : index
    %c0_14 = arith.constant 0 : index
    %18 = vector.load %arg7[%c0_12, %c0_13, %c0_14] : memref<1x4x256xf32, #tpu.memory_space<vmem>>, vector<1x4x256xf32>
    %19 = vector.shape_cast %18 : vector<1x4x256xf32> to vector<4x256xf32>
    %20 = vector.shape_cast %17 : vector<4x256xf32> to vector<1x4x256xf32>
    tpu.vector_store %arg7[%c0_12, %c0_13, %c0_14], %20 {strides = array<i32>} : memref<1x4x256xf32, #tpu.memory_space<vmem>>, vector<1x4x256xf32>,
    return
  }
  func.func @transform_0(%arg0: i32, %arg1: i32) -> (i32, i32, i32) {
    %c0_i32 = arith.constant 0 : i32
    %c0_i32_0 = arith.constant 0 : i32
    return %arg0, %c0_i32, %arg1 : i32, i32, i32
  }
  func.func @transform_1(%arg0: i32, %arg1: i32) -> (i32, i32) {
    %c0_i32 = arith.constant 0 : i32
    %c0_i32_0 = arith.constant 0 : i32
    %c0_i32_1 = arith.constant 0 : i32
    return %c0_i32, %c0_i32_0 : i32, i32
  }
  func.func @transform_2(%arg0: i32, %arg1: i32) -> (i32, i32) {
    %c0_i32 = arith.constant 0 : i32
    %c0_i32_0 = arith.constant 0 : i32
    %c0_i32_1 = arith.constant 0 : i32
    return %c0_i32, %c0_i32_0 : i32, i32
  }
  func.func @transform_3(%arg0: i32, %arg1: i32) -> (i32, i32) {
    %c0_i32 = arith.constant 0 : i32
    %c0_i32_0 = arith.constant 0 : i32
    %c0_i32_1 = arith.constant 0 : i32
    return %c0_i32, %c0_i32_0 : i32, i32
  }
  func.func @transform_4(%arg0: i32, %arg1: i32) -> (i32, i32) {
    %c0_i32 = arith.constant 0 : i32
    %c0_i32_0 = arith.constant 0 : i32
    %c0_i32_1 = arith.constant 0 : i32
    return %c0_i32, %c0_i32_0 : i32, i32
  }
  func.func @transform_5(%arg0: i32, %arg1: i32) -> (i32, i32, i32) {
    %c0_i32 = arith.constant 0 : i32
    %c0_i32_0 = arith.constant 0 : i32
    return %arg0, %c0_i32, %arg1 : i32, i32, i32
  }
}

</mosaic_0001>

<bundles_post_ra>
// kernel: tpu_custom_call.1
= control target key start
LH: loop header
LB: loop body
LE: loop exit
PB: predicated region body
PF: predicated region fallthrough
CT: control target
= control target key end

     0   :  { %10 = vsyncpa [#allocation3], 0  ;;  %s852_s0 = inlined_call_operand.vmem [shape: f32[2,12,256], index: 0, kind: input, shape index: {}]   ;;  %s853_s1 = inlined_call_operand.vmem [shape: f32[32,12], index: 1, kind: input, shape index: {}]   ;;  %s854_s2 = inlined_call_operand.vmem [shape: f32[32,1], index: 2, kind: input, shape index: {}]   ;;  %s855_s3 = inlined_call_operand.vmem [shape: f32[4,32], index: 3, kind: input, shape index: {}]   ;;  %s856_s4 = inlined_call_operand.vmem [shape: f32[4,1], index: 4, kind: input, shape index: {}]   ;;  %s857_s5 = inlined_call_operand.hbm [shape: f32[2,4,256], index: 5, kind: output, shape index: {}]  }
   0x1   :  { %12 = vsyncpa [#allocation3 + $0x1], 0  ;;  %s710_s18 = smov 0   ;;  %s712_s19 = smov 0  }
   0x2   :  { %s714_s20 = smov 0   ;;  %s716_s21 = smov 0  }
   0x3   :  { %s718_s22 = smov 0   ;;  %s720_s23 = smov 0  }
   0x4 LB: > { %s521_s24 = sadd.s32 4294967295, %s676_s23   ;;  %s522_s25 = sadd.s32 4294967294, %s676_s23   ;;  %s676_s23 = sphi %s720_s23, %s18_s23   ;;  %s672_s22 = sphi %s718_s22, %s864_s22   ;;  %s668_s21 = sphi %s716_s21, %s863_s21   ;;  %s664_s20 = sphi %s714_s20, %s862_s20   ;;  %s660_s19 = sphi %s712_s19, %s861_s19   ;;  %s656_s18 = sphi %s710_s18, %s860_s18  }
   0x5   : > { %s30_s26 = sadd.s32 1, %s672_s22  ;;  %s151_s27 = sadd.s32 1, %s664_s20 }
   0x6   : > { %p32_p0 = scmp.ge.s32.totalorder %s30_s26, 2  ;;  %p161_p1 = scmp.ne.s32.totalorder %s664_s20, %s660_s19 }
   0x7   : > { %p162_p2 = scmp.eq.s32.totalorder %s521_s24, 1  ;;  %p167_p3 = scmp.ne.s32.totalorder %s660_s19, %s656_s18 }
   0x8   : > { %s866_s26 = smov (%p32_p0, %s30_s26), 0  ;;  %p168_p5 = scmp.eq.s32.totalorder %s522_s25, 1 }
   0x9   : > { %p750_p4 = por %p162_p2, %p161_p1  ;;  %s146_s29 = ssub.s32 %s672_s22, %s866_s26 }
   0xa   : > { %p525_p6 = scmp.ge.s32.totalorder %s676_s23, 1  ;;  %p149_p7 = scmp.eq.s32.totalorder %s146_s29, 0 }
   0xb   : > { %p757_p8 = por %p168_p5, %p167_p3  ;;  %p211_p9 = scmp.lt.s32.totalorder %s676_s23, 3 }
   0xc   : > { %s763_s6 = scalar_select %p149_p7, %s664_s20, %s151_s27  }
   0xd   : > { %p212_p10 = pnand %p525_p6, %p211_p9 }
   0xe   : > { %p244_p11 = scmp.lt.s32.totalorder (!%p212_p10), %s668_s21, 1  ;;  %v678_v0 = vmov (!%p212_p10), 0   ;;  %v263_v1 = vld [vmem:[%s854_s2] sm:$0xff] (!%p212_p10)  ;;  %v265_v2 = vld [vmem:[%s854_s2 + $0x10] sm:$0xff] (!%p212_p10)  ;;  %v264_v3 = vld [vmem:[%s854_s2 + $0x8] sm:$0xff] (!%p212_p10)  ;;  %vm298_vm0 = vcmask (!%p212_p10), 1045504  }
   0xf   : > { %215 = sbr.rel (%p212_p10) target bundleno = 498 (0x1f2), region = 40  ;;  %337 = vmatprep.mubr.bf16.mxu0 (!%p212_p10), %v678_v0  ;;  %596 = vset.pattern.permute.xlu0 (!%p212_p10), %v678_v0  ;;  %v266_v4 = vld [vmem:[%s854_s2 + $0x18] sm:$0xff] (!%p212_p10)  ;;  %v259_v5 = vld [vmem:[%s853_s1] sm:$0xff] (!%p212_p10)  ;;  %v260_v11 = vld [vmem:[%s853_s1 + $0x8] sm:$0xff] (!%p212_p10)  ;;  %vm291_vm1 = vcmask (!%p212_p10), 97280   ;;  %vm378_vm2 = vcmask (!%p212_p10), 261120  }
  0x10   : > { %273 = vperm.xlu0 (!%p212_p10), %596, %v263_v1   ;;  %597 = vset.pattern.permute.xlu1 (!%p212_p10), %v678_v0  ;;  %v367_v12 = vld [vmem:[%s856_s4] sm:$0xf] (!%p212_p10)  ;;  %v267_v15 = vpack.c.bf16 (!%p212_p10), %v260_v11, %v259_v5  ;;  %v261_v16 = vld [vmem:[%s853_s1 + $0x10] sm:$0xff] (!%p212_p10)  ;;  %v262_v17 = vld [vmem:[%s853_s1 + $0x18] sm:$0xff] (!%p212_p10)  ;;  %s240_s17 = sand.u32 (!%p212_p10), 1, %s660_s19  }
  0x11   : > { %283 = vperm.xlu1 (!%p212_p10), %597, %v265_v2   ;;  %414 = vmatprep.mubr.bf16.mxu1 (!%p212_p10), %v678_v0  ;;  %v268_v18 = vpack.c.bf16 (!%p212_p10), %v262_v17, %v261_v16  ;;  %v366_v50 = vld [vmem:[%s855_s3] sm:$0xf] (!%p212_p10)  ;;  %s526_s24 = sshll.u32 (!%p212_p10), %s240_s17, 3  ;;  %s429_s10 = scalar_lea.sflag (!%p212_p10), [#allocation3], %s240_s17 }
  0x12   : > { %v368_v52 = vpack.c.bf16 (!%p212_p10), %v366_v50, %v366_v50  ;;  %s242_s27 = scalar_lea.vmem (!%p212_p10), [#allocation2], %s526_s24 }
  0x13   : > { %s445_s29 = sshll.u32 (!%p212_p10), %s242_s27, 4  ;;  %s807_s29 = int_to_ptr.vmem [resolvable:$true] %s445_s29 }
  0x14   : > { %278 = vperm.xlu0 (!%p212_p10), %596, %v264_v3   ;;  %s598_s11 = scalar_lea.vmem (!%p212_p10), %s807_s29, 128 }
  0x15   : > { %288 = vperm.xlu1 (!%p212_p10), %597, %v266_v4   ;;  %p599_p12 = scmp.ne.s32.totalorder (!%p212_p10), %s807_s29, %s598_s11 }
  0x16   : > { %s245_s9 = scalar_select %p244_p11, %s668_s21, 1 }
  0x17   : > { %p600_p13 = pnand %p599_p12, %p750_p4 }
  0x18   : > { %s538_s14 = sshll.u32 %s245_s9, 5  ;;  %375 = vperm.xlu0 %596, %v367_v12  }
  0x19   : > { %s251_s25 = scalar_lea.vmem %s852_s0, %s538_s14  ;;  %p601_p0 = pneg %p600_p13 }
  0x1a   : > { %v256_v6 = vld [vmem:[%s251_s25 + $0x8] sm:$0xff]  ;;  %v258_v7 = vld [vmem:[%s251_s25 + $0x18] sm:$0xf]  ;;  %v255_v8 = vld [vmem:[%s251_s25] sm:$0xff] }
  0x1b   : > { %v270_v9 = vpack.c.bf16 %v258_v7, %v256_v6  ;;  %v257_v10 = vld [vmem:[%s251_s25 + $0x10] sm:$0xf]  ;;  %s539_s25 = sshll.u32 %s668_s21, 7  ;;  %s679_s21 = smov [#allocation2]  }
  0x1c   : > { %v269_v13 = vpack.c.bf16 %v257_v10, %v255_v8  ;;  %s805_s9 = scalar_lea.hbm %s857_s5, %s539_s25  ;;  %s602_s12 = sshll.u32 %s679_s21, 4  ;;  %s603_s12 = int_to_ptr.vmem [resolvable:$false] %s602_s12 }
  0x1d   : > { %529 = vmatprep.subr.msk.bf16.mxu0 %vm298_vm0, %v270_v9  ;;  %s604_s13 = scalar_lea.vmem %s603_s12, 256  ;;  %p605_p1 = scmp.lt.s32.totalorder %s807_s29, %s603_s12 }
  0x1e   : > { %v300_v14 = vsel %vm298_vm0, %v269_v13, 0  ;;  %p606_p2 = scmp.lt.s32.totalorder %s604_s13, %s598_s11 }
  0x1f   : > { %306 = vmatpush1.bf16.msra.mxu0 %v300_v14 }
  0x20   : > { %p607_p3 = por %p606_p2, %p605_p1 }
  0x22   : > { %530 = vmatmul.mubr.msk.bf16.vlgmr.msra.gmra.mrb[0].mxu0 %vm291_vm1, %v267_v15  ;;  %p608_p5 = pnand %p607_p3, %p601_p0 }
  0x23   : > { %347 = vmatprep.mubr.bf16.mxu0 %v678_v0 }
  0x2a   : > { %531 = vmatmul.mubr.msk.bf16.gmra.mrb[4].mxu0 %vm291_vm1, %v268_v18 }
  0x8f   : > { %v274_v19 = vpop.permute.xlu0 %273 }
  0x90   : > { %v284_v28 = vpop.permute.xlu1 %283 }
  0x93   : > { %v279_v23 = vpop.permute.xlu0 %278 }
  0x94   : > { %v289_v39 = vpop.permute.xlu1 %288 }
  0x97   : > { %v376_v53 = vpop.permute.xlu0 %375 }
  0xf5   : > { %v339_v20 = vpop.f32.mrb[0].mxu0 }
  0xf6   : > { %v340_v21 = vadd.f32 %v339_v20, %v274_v19  ;;  %v341_v22 = vpop.f32.mrb[1].mxu0 }
  0xf7   : > { %v342_v24 = vadd.f32 %v341_v22, %v274_v19  ;;  %v343_v25 = vpop.f32.mrb[2].mxu0 }
  0xf8   : > { %v344_v26 = vadd.f32 %v343_v25, %v279_v23  ;;  %v345_v27 = vpop.f32.mrb[3].mxu0  ;;  %v358_v30 = vmax.f32 %v340_v21, 0.0 }
  0xf9   : > { %v346_v29 = vadd.f32 %v345_v27, %v279_v23  ;;  %v359_v32 = vmax.f32 %v342_v24, 0.0 }
  0xfa   : > { %v360_v31 = vmax.f32 %v344_v26, 0.0 }
  0xfb   : > { %v361_v33 = vmax.f32 %v346_v29, 0.0 }
  0xfc   : > { %v369_v34 = vpack.c.bf16 %v360_v31, %v358_v30 }
  0xfd   : > { %v349_v35 = vpop.f32.mrb[4].mxu0  ;;  %v370_v36 = vpack.c.bf16 %v361_v33, %v359_v32 }
  0xfe   : > { %v350_v37 = vadd.f32 %v349_v35, %v284_v28  ;;  %v351_v38 = vpop.f32.mrb[5].mxu0 }
  0xff   : > { %v352_v40 = vadd.f32 %v351_v38, %v284_v28  ;;  %v353_v41 = vpop.f32.mrb[6].mxu0  ;;  %382 = vmatprep.subr.bf16.mxu1 %v370_v36 }
 0x100   : > { %v354_v42 = vadd.f32 %v353_v41, %v289_v39  ;;  %v355_v43 = vpop.f32.mrb[7].mxu0  ;;  %383 = vmatpush1.bf16.msra.mxu1 %v369_v34  ;;  %v362_v45 = vmax.f32 %v350_v37, 0.0 }
 0x101   : > { %v356_v44 = vadd.f32 %v355_v43, %v289_v39  ;;  %v363_v47 = vmax.f32 %v352_v40, 0.0 }
 0x102   : > { %v364_v46 = vmax.f32 %v354_v42, 0.0 }
 0x103   : > { %v365_v48 = vmax.f32 %v356_v44, 0.0 }
 0x104   : > { %v371_v49 = vpack.c.bf16 %v364_v46, %v362_v45 }
 0x105   : > { %v372_v51 = vpack.c.bf16 %v365_v48, %v363_v47 }
 0x107   : > { %384 = vmatprep.subr.bf16.mxu1 %v372_v51 }
 0x108   : > { %385 = vmatpush1.bf16.msra.mxu1 %v371_v49 }
 0x10b   : > { %532 = vmatmul.mubr.msk.bf16.vlgmr.msra.gmra.mrb[0].mxu1 %vm378_vm2, %v368_v52 }
 0x1de   : > { %v416_v54 = vpop.f32.mrb[0].mxu1 }
 0x1df   : > { %v417_v55 = vadd.f32 %v416_v54, %v376_v53  ;;  %v418_v56 = vpop.f32.mrb[1].mxu1 }
 0x1e0   : > { %v419_v57 = vadd.f32 %v418_v56, %v376_v53  ;;  %v420_v58 = vpop.f32.mrb[2].mxu1 }
 0x1e1   : > { %v421_v59 = vpop.f32.mrb[3].mxu1 }
 0x1e2   : > { %v425_v60 = vcombine.low %v417_v55, %v419_v57 }
 0x1e4   : > { %427 = vst [vmem:[%s242_s27] sm:$0xff] %v425_v60 }
 0x1e5   : > { %611 = shalt.err (!%p608_p5)
}
 0x1e6   : > { %s612_s14 = scalar_lea.hbm %s805_s9, 128  ;;  %s616_s17 = scalar_lea.hbm %s857_s5, 256 }
 0x1e7   : > { %p613_p6 = scmp.ne.s32.totalorder %s805_s9, %s612_s14  ;;  %p617_p10 = scmp.lt.u32.totalorder %s805_s9, %s857_s5 }
 0x1e8   : > { %p618_p11 = scmp.lt.u32.totalorder %s616_s17, %s612_s14  ;;  %p620_p13 = scmp.lt.u32.totalorder %s612_s14, %s805_s9 }
 0x1e9   : > { %p614_p7 = pnand %p613_p6, %p750_p4 }
 0x1ea   : > { %p619_p12 = por %p618_p11, %p617_p10 }
 0x1eb   : > { %p615_p9 = pneg %p614_p7 }
 0x1ec   : > { %p621_p0 = por %p620_p13, %p619_p12 }
 0x1ee   : > { %p622_p1 = pnand %p621_p0, %p615_p9 }
 0x1f0   : > { %625 = shalt.err (!%p622_p1)
}
 0x1f1   : > { %540 = dma.vmem_to_hbm [thread:$0]  (%p750_p4), %s807_s29, 128, %s805_s9, %s429_s10  }
 0x1f2 PF: > { %p546_p2 = scmp.ge.s32.totalorder %s676_s23, 2  ;;  %s457_s27 = sand.u32 1, %s656_s18  }
 0x1f3   : > { %s458_s7 = scalar_lea.sflag [#allocation3], %s457_s27 }
 0x1f4   : > { %p543_p3 = pnand %p546_p2, %p757_p8 }
 0x1f6   : > { %651 = dma.done.wait (!%p543_p3), %s458_s7, 128  }
 0x1f7   : > { %653 = vsyncadd (!%p543_p3), %s458_s7, 4294967168  ;;  %s18_s23 = sadd.s32 1, %s676_s23   ;;  %s860_s18 = smov %s660_s19 }
 0x1f8   : > { %p15_p5 = scmp.ge.s32.totalorder %s18_s23, 4   ;;  %s861_s19 = smov %s664_s20 }
 0x1f9   : > { %s862_s20 = smov %s763_s6  ;;  %s863_s21 = smov %s672_s22 }
 0x1fa   : > { %s864_s22 = smov %s866_s26  ;;  %17 = sbr.rel (!%p15_p5) target bundleno = 4 (0x4), region = 75 }
 0x201   :  { %463 = vsyncpa [#allocation3], 1 }
 0x202   :  { %465 = vsyncpa [#allocation3 + $0x1], 1 }

</bundles_post_ra>
